<compile_context>
chip_gen: v7x
topology: tpu7x:2x2x1
jax: 0.10.0
libtpu: 0.0.40
codegen_flags: <defaults>
</compile_context>

<pallas_src>
import math
import numpy as np
import jax
import jax.numpy as jnp
from jax.experimental import pallas as pl
from jax.experimental.pallas import tpu as pltpu

T = 10
dt = 0.2
N = int(T / dt) + 1          # 51
STATE_DIM = 3


# ----------------------------------------------------------------------------
# Pallas kernel: fused masked Normal log-prob + full reduction + batch mean
# ----------------------------------------------------------------------------
def _obs_loglik_kernel(x_ref, mu_ref, a_ref, c_ref, o_ref):
    """o = mean_b( sum_{s,t} a[0,s,t]*(x[b,s,t]-mu[0,s,t])^2 + c[0,s,t] )

    x_ref : (B, S, N) f32 VMEM   full trajectory
    mu_ref: (1, S, N) f32 VMEM   observation means scattered onto full grid
    a_ref : (1, S, N) f32 VMEM   -0.5/scale^2 at observed columns, 0 elsewhere
    c_ref : (1, S, N) f32 VMEM   -log(scale)-0.5*log(2pi) at observed, 0 elsewhere
    o_ref : (1, 1)    f32 SMEM   scalar output
    """
    x = x_ref[...]
    d = x - mu_ref[...]                       # broadcast over the batch dim
    ll = a_ref[...] * (d * d) + c_ref[...]    # per-element log-prob (0 off-obs)
    inv_b = 1.0 / x_ref.shape[0]              # static batch size
    o_ref[0, 0] = jnp.sum(ll) * inv_b


# ----------------------------------------------------------------------------
# Wrapper
# ----------------------------------------------------------------------------
def obs_model_forward(params, x):
    """x: (B, STATE_DIM, N) float.  Returns scalar mean summed log-likelihood."""
    out = pl.pallas_call(
        _obs_loglik_kernel,
        out_shape=jax.ShapeDtypeStruct((1, 1), jnp.float32),
        in_specs=[pl.BlockSpec(memory_space=pltpu.MemorySpace.VMEM)] * 4,
        out_specs=pl.BlockSpec(memory_space=pltpu.MemorySpace.SMEM),
    )(x.astype(jnp.float32), params['mu_full'], params['a_full'],
      params['c_full'])
    return out[0, 0]


# ----------------------------------------------------------------------------
# Parameter precompute ("__init__" of the PyTorch module)
# ----------------------------------------------------------------------------
def _get_idx(times):
    # Matches the PyTorch module: (times / dt).astype(int)
    return np.asarray(np.asarray(times, np.float64) / dt).astype(int)


def init_obs_model(times, mu, scale):
    """Precompute full-grid Normal log-prob coefficients (host-side, once)."""
    idx = _get_idx(times)
    n_obs = len(idx)
    mu = np.asarray(mu, np.float32).reshape(STATE_DIM, n_obs)
    scale = np.broadcast_to(np.asarray(scale, np.float32), mu.shape)

    mu_full = np.zeros((1, STATE_DIM, N), np.float32)
    a_full = np.zeros((1, STATE_DIM, N), np.float32)
    c_full = np.zeros((1, STATE_DIM, N), np.float32)
    mu_full[0][:, idx] = mu
    a_full[0][:, idx] = -0.5 / (scale ** 2)
    c_full[0][:, idx] = -np.log(scale) - 0.5 * math.log(2.0 * math.pi)

    return {
        'mu_full': jnp.asarray(mu_full),
        'a_full': jnp.asarray(a_full),
        'c_full': jnp.asarray(c_full),
        # kept for the pure-JAX reference / plotting helpers
        'idx': idx,
        'mu': jnp.asarray(mu),
        'scale': jnp.asarray(scale),
    }


# ----------------------------------------------------------------------------
# Pure-JAX reference (mirrors the PyTorch forward literally)
# ----------------------------------------------------------------------------
def obs_model_forward_ref(params, x):
    xg = x[:, :, params['idx']]                         # (B, S, n_obs)
    mu = params['mu'][None]                             # (1, S, n_obs)
    scale = params['scale'][None]
    ll = (-0.5 * ((xg - mu) / scale) ** 2
          - jnp.log(scale) - 0.5 * math.log(2.0 * math.pi))
    return jnp.mean(jnp.sum(ll, axis=(-1, -2)))


# ----------------------------------------------------------------------------
if __name__ == "__main__":
    key = jax.random.PRNGKey(0)
    k_mu, k_x = jax.random.split(key)

    B = 2
    obs_steps = np.array([0, 6, 12, 19, 25, 31, 38, 44])   # distinct time bins
    times = obs_steps * dt
    n_obs = len(obs_steps)

    mu = jax.random.normal(k_mu, (1, STATE_DIM, n_obs), jnp.float32)
    scale = 0.3

    params = init_obs_model(times, np.asarray(mu), scale)
    x = jax.random.normal(k_x, (B, STATE_DIM, N), jnp.float32)

    out = obs_model_forward(params, x)
    jax.block_until_ready(out)

    ref = obs_model_forward_ref(params, x)
    assert out.shape == ()
    assert bool(jnp.isfinite(out))
    assert abs(float(out) - float(ref)) <= 1e-4 * max(1.0, abs(float(ref)))
    print("KERNEL_OK")
</pallas_src>

<mosaic_0001>
module attributes {stable_mosaic.version = 11 : i64} {
  func.func @_obs_loglik_kernel(%arg0: memref<2x3x51xf32, #tpu.memory_space<vmem>>, %arg1: memref<1x3x51xf32, #tpu.memory_space<vmem>>, %arg2: memref<1x3x51xf32, #tpu.memory_space<vmem>>, %arg3: memref<1x3x51xf32, #tpu.memory_space<vmem>>, %arg4: memref<1x1xf32, #tpu.memory_space<smem>>) attributes {dimension_semantics = [], scalar_prefetch = 0 : i64, scratch_operands = 0 : i64, tpu.core_type = #tpu.core_type<tc>} {
    %c0 = arith.constant 0 : index
    %c0_0 = arith.constant 0 : index
    %c0_1 = arith.constant 0 : index
    %0 = vector.load %arg0[%c0, %c0_0, %c0_1] : memref<2x3x51xf32, #tpu.memory_space<vmem>>, vector<2x3x51xf32>
    %c0_2 = arith.constant 0 : index
    %c0_3 = arith.constant 0 : index
    %c0_4 = arith.constant 0 : index
    %1 = vector.load %arg1[%c0_2, %c0_3, %c0_4] : memref<1x3x51xf32, #tpu.memory_space<vmem>>, vector<1x3x51xf32>
    %2 = vector.broadcast %1 : vector<1x3x51xf32> to vector<2x3x51xf32>
    %3 = arith.subf %0, %2 : vector<2x3x51xf32>
    %c0_5 = arith.constant 0 : index
    %c0_6 = arith.constant 0 : index
    %c0_7 = arith.constant 0 : index
    %4 = vector.load %arg2[%c0_5, %c0_6, %c0_7] : memref<1x3x51xf32, #tpu.memory_space<vmem>>, vector<1x3x51xf32>
    %5 = arith.mulf %3, %3 : vector<2x3x51xf32>
    %6 = vector.broadcast %4 : vector<1x3x51xf32> to vector<2x3x51xf32>
    %7 = arith.mulf %6, %5 : vector<2x3x51xf32>
    %c0_8 = arith.constant 0 : index
    %c0_9 = arith.constant 0 : index
    %c0_10 = arith.constant 0 : index
    %8 = vector.load %arg3[%c0_8, %c0_9, %c0_10] : memref<1x3x51xf32, #tpu.memory_space<vmem>>, vector<1x3x51xf32>
    %9 = vector.broadcast %8 : vector<1x3x51xf32> to vector<2x3x51xf32>
    %10 = arith.addf %7, %9 : vector<2x3x51xf32>
    %11 = vector.shape_cast %10 : vector<2x3x51xf32> to vector<1x2x3x51xf32>
    %cst = arith.constant dense<0.000000e+00> : vector<1xf32>
    %12 = vector.multi_reduction <add>, %11, %cst [1, 2, 3] : vector<1x2x3x51xf32> to vector<1xf32>
    %13 = vector.shape_cast %12 : vector<1xf32> to vector<1x1x1x1xf32>
    %14 = vector.extract %13[0, 0, 0, 0] : f32 from vector<1x1x1x1xf32>
    %cst_11 = arith.constant 5.000000e-01 : f32
    %15 = arith.mulf %14, %cst_11 : f32
    %c0_12 = arith.constant 0 : index
    %c0_13 = arith.constant 0 : index
    %16 = memref.load %arg4[%c0_12, %c0_13] : memref<1x1xf32, #tpu.memory_space<smem>>
    memref.store %15, %arg4[%c0_12, %c0_13] : memref<1x1xf32, #tpu.memory_space<smem>>
    return
  }
}

</mosaic_0001>

<bundles_post_ra>
// kernel: tpu_custom_call.1
= control target key start
LH: loop header
LB: loop body
LE: loop exit
PB: predicated region body
PF: predicated region fallthrough
CT: control target
= control target key end

     0   :  { %s128_s0 = inlined_call_operand.vmem [shape: f32[2,3,51], index: 0, kind: input, shape index: {}]   ;;  %s129_s1 = inlined_call_operand.vmem [shape: f32[1,3,51], index: 1, kind: input, shape index: {}]   ;;  %s130_s2 = inlined_call_operand.vmem [shape: f32[1,3,51], index: 2, kind: input, shape index: {}]   ;;  %s131_s3 = inlined_call_operand.vmem [shape: f32[1,3,51], index: 3, kind: input, shape index: {}]   ;;  %s132_s4 = inlined_call_operand.hbm [shape: f32[1,1], index: 4, kind: output, shape index: {}]  }
   0x1   :  { %v18_v0 = vld [vmem:[%s128_s0] sm:$0x7]  ;;  %v19_v1 = vld [vmem:[%s128_s0 + $0x4] sm:$0x7] }
   0x2   :  { %v20_v2 = vld [vmem:[%s129_s1] sm:$0x7] }
   0x3   :  { %v21_v3 = vsub.f32 %v18_v0, %v20_v2  ;;  %v22_v4 = vsub.f32 %v19_v1, %v20_v2  ;;  %v23_v5 = vld [vmem:[%s130_s2] sm:$0x7] }
   0x4   :  { %9 = vsyncpa [#allocation3], 0  ;;  %v28_v8 = vld [vmem:[%s131_s3] sm:$0x7]  ;;  %vm31_vm0 = vcmask 411648   ;;  %s63_s25 = scalar_lea.hbm %s132_s4, 16 }
   0x5   :  { %v24_v6 = vmul.f32 %v21_v3, %v21_v3  ;;  %v25_v7 = vmul.f32 %v22_v4, %v22_v4  ;;  %p64_p0 = scmp.ne.s32.totalorder %s132_s4, %s63_s25  ;;  %p67_p1 = scmp.lt.u32.totalorder %s63_s25, %s132_s4 }
   0x7   :  { %v26_v9 = vmul.f32 %v24_v6, %v23_v5  ;;  %v27_v10 = vmul.f32 %v25_v7, %v23_v5  ;;  %p69_p2 = pnand %p67_p1, %p64_p0 }
   0x9   :  { %v29_v11 = vadd.f32 %v28_v8, %v26_v9  ;;  %v30_v12 = vadd.f32 %v28_v8, %v27_v10 }
   0xb   :  { %v32_v13 = vsel %vm31_vm0, %v29_v11, 0.0  ;;  %v33_v14 = vsel %vm31_vm0, %v30_v12, 0.0 }
   0xc   :  { %v34_v15 = vadd.f32 %v33_v14, %v32_v13 }
   0xe   :  { %35 = vadd.xlane.f32.xlu0 %v34_v15 }
  0x9b   :  { %v36_v16 = vpop.xlane.xlu0 %35 }
  0x9c   :  { %v37_v17 = vrot.slane %v36_v16, 4 }
  0x9e   :  { %v38_v18 = vadd.f32 %v37_v17, %v36_v16 }
  0xa0   :  { %v39_v19 = vrot.slane %v38_v18, 2 }
  0xa2   :  { %v40_v20 = vadd.f32 %v39_v19, %v38_v18 }
  0xa4   :  { %v41_v21 = vrot.slane %v40_v20, 1 }
  0xa6   :  { %v42_v22 = vadd.f32 %v41_v21, %v40_v20 }
  0xa8   :  { %60 = vpush %v42_v22 }
  0xd9   :  { %s61_s0 = spop %60 }
  0xda   :  { %s44_s1 = smul.f32 0.5, %s61_s0 }
  0xdc   :  { %46 = sst [smem:[#allocation2]] %s44_s1 }
  0xdd   :  { %72 = shalt.err (!%p69_p2)
}
  0xde   :  { %s75_s30 = smov [#allocation2]  }
  0xdf   :  { %54 = dma.smem_to_hbm %s75_s30, 16, %s132_s4, [#allocation3]  }
  0xe0   :  { %73 = dma.done.wait [#allocation3], 16  }
  0xe1   :  { %74 = vsyncadd [#allocation3], 4294967280 }
  0xe2   :  { %58 = sfence }
  0xe3   :  { %59 = vsyncpa [#allocation3], 1 }

</bundles_post_ra>
